<compile_context>
chip_gen: v7x
topology: tpu7x:2x2x1
jax: 0.10.0
libtpu: 0.0.40
codegen_flags: <defaults>
</compile_context>

<pallas_src>
import functools

import jax
import jax.numpy as jnp
from jax import lax
from jax.experimental import pallas as pl
from jax.experimental.pallas import tpu as pltpu


def _round_up(x, m):
    return (x + m - 1) // m * m


def _ae_kernel(n_layers, out_pads, x_ref, b_ref, *refs):
    """refs = (w1, ..., wL, enc_out, dec_out).  All dims are 128-lane padded."""
    w_refs = refs[:n_layers]
    enc_ref = refs[n_layers]
    dec_ref = refs[n_layers + 1]

    b_all = b_ref[...]                       # (L, max_out_pad), zero-padded

    # ---- encoder: h = W_L(... relu(W_1 x + b_1) ...) + b_L ----
    h = x_ref[...]                           # (tile_b, in_pad)
    for i in range(n_layers):
        w = w_refs[i][...]                   # (out_pad_i, in_pad_i) — PyTorch layout
        b = b_all[i : i + 1, : out_pads[i]]  # (1, out_pad_i) — static slice
        # h @ w.T with the transpose folded into the MXU contraction.
        h = lax.dot_general(
            h, w,
            dimension_numbers=(((1,), (1,)), ((), ())),
            preferred_element_type=jnp.float32,
        ) + b
        if i < n_layers - 1:
            h = jnp.maximum(h, 0.0)
    enc_ref[...] = h

    # ---- decoder: tied (transposed) weights, reversed order, no bias ----
    d = h
    for i in reversed(range(n_layers)):
        w = w_refs[i][...]                   # (out_pad_i, in_pad_i): d @ w maps out_i -> in_i
        d = jnp.dot(d, w, preferred_element_type=jnp.float32)
        if i > 0:
            d = jnp.maximum(d, 0.0)
    dec_ref[...] = d


def autoencoder_forward(x, weights, biases, *, tile_b=256):
    """x: (B, n_in) f32; weights[i]: (out_i, in_i) (PyTorch layout); biases[i]: (out_i,)."""
    n_layers = len(weights)
    batch, n_in = x.shape
    code_dim = weights[-1].shape[0]

    # Lane-pad every feature dim to a multiple of 128 (exact: pads are zero).
    dims = [n_in] + [int(w.shape[0]) for w in weights]
    dims_pad = [_round_up(d, 128) for d in dims]

    # Batch tiling: sublane-aligned tile, pad batch to a tile multiple.
    tile_b = min(tile_b, _round_up(batch, 8))
    batch_pad = _round_up(batch, tile_b)

    x_p = jnp.zeros((batch_pad, dims_pad[0]), jnp.float32)
    x_p = x_p.at[:batch, :n_in].set(x.astype(jnp.float32))

    w_p = []
    for i, w in enumerate(weights):
        wp = jnp.zeros((dims_pad[i + 1], dims_pad[i]), jnp.float32)
        wp = wp.at[: w.shape[0], : w.shape[1]].set(w)
        w_p.append(wp)

    max_out_pad = max(dims_pad[1:])
    b_p = jnp.zeros((n_layers, max_out_pad), jnp.float32)
    for i, b in enumerate(biases):
        b_p = b_p.at[i, : b.shape[0]].set(b)

    out_pads = tuple(dims_pad[1:])
    kernel = functools.partial(_ae_kernel, n_layers, out_pads)

    grid = (batch_pad // tile_b,)
    in_specs = [
        # x: batch-tiled, lane-dense
        pl.BlockSpec((tile_b, dims_pad[0]), lambda i: (i, 0)),
        # packed biases: full array, resident across the grid
        pl.BlockSpec((n_layers, max_out_pad), lambda i: (0, 0)),
    ] + [
        # weights: full arrays, constant index_map -> stay resident in VMEM
        pl.BlockSpec(wp.shape, lambda i: (0, 0))
        for wp in w_p
    ]
    out_specs = (
        pl.BlockSpec((tile_b, dims_pad[-1]), lambda i: (i, 0)),  # encoded
        pl.BlockSpec((tile_b, dims_pad[0]), lambda i: (i, 0)),   # decoded
    )

    enc_p, dec_p = pl.pallas_call(
        kernel,
        out_shape=(
            jax.ShapeDtypeStruct((batch_pad, dims_pad[-1]), jnp.float32),
            jax.ShapeDtypeStruct((batch_pad, dims_pad[0]), jnp.float32),
        ),
        grid=grid,
        in_specs=in_specs,
        out_specs=out_specs,
        compiler_params=pltpu.CompilerParams(
            dimension_semantics=("parallel",),
        ),
    )(x_p, b_p, *w_p)

    # Slice back to the logical (unpadded) shapes.
    return enc_p[:batch, :code_dim], dec_p[:batch, :n_in]


def _init_params(key, n_in, encoder_units):
    """Deterministic init matching torch.nn.Linear default (U[-1/sqrt(in), 1/sqrt(in)])."""
    dims = [n_in] + list(encoder_units)
    weights, biases = [], []
    for i in range(1, len(dims)):
        fan_in, fan_out = dims[i - 1], dims[i]
        key, kw, kb = jax.random.split(key, 3)
        bound = 1.0 / jnp.sqrt(fan_in)
        weights.append(
            jax.random.uniform(kw, (fan_out, fan_in), jnp.float32, -bound, bound)
        )
        biases.append(
            jax.random.uniform(kb, (fan_out,), jnp.float32, -bound, bound)
        )
    return weights, biases


def _reference_forward(x, weights, biases):
    """Plain-JAX reference mirroring the PyTorch forward."""
    h = x
    n_layers = len(weights)
    for i, (w, b) in enumerate(zip(weights, biases)):
        h = h @ w.T + b
        if i < n_layers - 1:
            h = jnp.maximum(h, 0.0)
    encoded = h
    d = encoded
    for i in reversed(range(n_layers)):
        d = d @ weights[i]
        if i > 0:
            d = jnp.maximum(d, 0.0)
    return encoded, d


if __name__ == "__main__":
    n_in = 64
    encoder_units = [32, 16, 8]
    batch = 8

    key = jax.random.PRNGKey(0)
    key, kx = jax.random.split(key)
    x = jax.random.normal(kx, (batch, n_in), jnp.float32)
    weights, biases = _init_params(key, n_in, encoder_units)

    encoded, decoded = autoencoder_forward(x, weights, biases)
    jax.block_until_ready((encoded, decoded))

    enc_ref, dec_ref = _reference_forward(x, weights, biases)
    assert encoded.shape == (batch, encoder_units[-1])
    assert decoded.shape == (batch, n_in)
    assert jnp.allclose(encoded, enc_ref, atol=1e-5, rtol=1e-5)
    assert jnp.allclose(decoded, dec_ref, atol=1e-5, rtol=1e-5)

    print("KERNEL_OK")
</pallas_src>

<mosaic_0001>
module attributes {stable_mosaic.version = 11 : i64} {
  func.func @_ae_kernel(%arg0: i32, %arg1: memref<8x128xf32, #tpu.memory_space<vmem>>, %arg2: memref<3x128xf32, #tpu.memory_space<vmem>>, %arg3: memref<128x128xf32, #tpu.memory_space<vmem>>, %arg4: memref<128x128xf32, #tpu.memory_space<vmem>>, %arg5: memref<128x128xf32, #tpu.memory_space<vmem>>, %arg6: memref<8x128xf32, #tpu.memory_space<vmem>>, %arg7: memref<8x128xf32, #tpu.memory_space<vmem>>) attributes {dimension_semantics = [#tpu.dimension_semantics<parallel>], iteration_bounds = array<i64: 1>, scalar_prefetch = 0 : i64, scratch_operands = 0 : i64, tpu.core_type = #tpu.core_type<tc>, window_params = [{transform_indices = @transform_0, window_bounds = array<i64: 8, 128>}, {pipeline_mode = #tpu.pipeline_mode<synchronous>, transform_indices = @transform_1, window_bounds = array<i64: 3, 128>}, {pipeline_mode = #tpu.pipeline_mode<synchronous>, transform_indices = @transform_2, window_bounds = array<i64: 128, 128>}, {pipeline_mode = #tpu.pipeline_mode<synchronous>, transform_indices = @transform_3, window_bounds = array<i64: 128, 128>}, {pipeline_mode = #tpu.pipeline_mode<synchronous>, transform_indices = @transform_4, window_bounds = array<i64: 128, 128>}, {transform_indices = @transform_5, window_bounds = array<i64: 8, 128>}, {transform_indices = @transform_6, window_bounds = array<i64: 8, 128>}]} {
    %c0 = arith.constant 0 : index
    %c0_0 = arith.constant 0 : index
    %0 = vector.load %arg2[%c0, %c0_0] : memref<3x128xf32, #tpu.memory_space<vmem>>, vector<3x128xf32>
    %c0_1 = arith.constant 0 : index
    %c0_2 = arith.constant 0 : index
    %1 = vector.load %arg1[%c0_1, %c0_2] : memref<8x128xf32, #tpu.memory_space<vmem>>, vector<8x128xf32>
    %c0_3 = arith.constant 0 : index
    %c0_4 = arith.constant 0 : index
    %2 = vector.load %arg3[%c0_3, %c0_4] : memref<128x128xf32, #tpu.memory_space<vmem>>, vector<128x128xf32>
    %3 = vector.extract_strided_slice %0 {offsets = [0, 0], sizes = [1, 128], strides = [1, 1]} : vector<3x128xf32> to vector<1x128xf32>
    %cst = arith.constant dense<0.000000e+00> : vector<8x128xf32>
    %4 = tpu.matmul %1, %2, %cst {dimension_numbers = #tpu.dot_dimension_numbers<[1], [1], [0], [0], [0, 0, 1, 0], [], []>} : vector<8x128xf32>, vector<128x128xf32>, vector<8x128xf32> -> vector<8x128xf32>
    %5 = vector.broadcast %3 : vector<1x128xf32> to vector<8x128xf32>
    %6 = arith.addf %4, %5 : vector<8x128xf32>
    %cst_5 = arith.constant 0.000000e+00 : f32
    %7 = vector.broadcast %cst_5 : f32 to vector<8x128xf32>
    %8 = arith.maximumf %6, %7 : vector<8x128xf32>
    %c0_6 = arith.constant 0 : index
    %c0_7 = arith.constant 0 : index
    %9 = vector.load %arg4[%c0_6, %c0_7] : memref<128x128xf32, #tpu.memory_space<vmem>>, vector<128x128xf32>
    %10 = vector.extract_strided_slice %0 {offsets = [1, 0], sizes = [1, 128], strides = [1, 1]} : vector<3x128xf32> to vector<1x128xf32>
    %cst_8 = arith.constant dense<0.000000e+00> : vector<8x128xf32>
    %11 = tpu.matmul %8, %9, %cst_8 {dimension_numbers = #tpu.dot_dimension_numbers<[1], [1], [0], [0], [0, 0, 1, 0], [], []>} : vector<8x128xf32>, vector<128x128xf32>, vector<8x128xf32> -> vector<8x128xf32>
    %12 = vector.broadcast %10 : vector<1x128xf32> to vector<8x128xf32>
    %13 = arith.addf %11, %12 : vector<8x128xf32>
    %cst_9 = arith.constant 0.000000e+00 : f32
    %14 = vector.broadcast %cst_9 : f32 to vector<8x128xf32>
    %15 = arith.maximumf %13, %14 : vector<8x128xf32>
    %c0_10 = arith.constant 0 : index
    %c0_11 = arith.constant 0 : index
    %16 = vector.load %arg5[%c0_10, %c0_11] : memref<128x128xf32, #tpu.memory_space<vmem>>, vector<128x128xf32>
    %17 = vector.extract_strided_slice %0 {offsets = [2, 0], sizes = [1, 128], strides = [1, 1]} : vector<3x128xf32> to vector<1x128xf32>
    %cst_12 = arith.constant dense<0.000000e+00> : vector<8x128xf32>
    %18 = tpu.matmul %15, %16, %cst_12 {dimension_numbers = #tpu.dot_dimension_numbers<[1], [1], [0], [0], [0, 0, 1, 0], [], []>} : vector<8x128xf32>, vector<128x128xf32>, vector<8x128xf32> -> vector<8x128xf32>
    %19 = vector.broadcast %17 : vector<1x128xf32> to vector<8x128xf32>
    %20 = arith.addf %18, %19 : vector<8x128xf32>
    %c0_13 = arith.constant 0 : index
    %c0_14 = arith.constant 0 : index
    %21 = vector.load %arg6[%c0_13, %c0_14] : memref<8x128xf32, #tpu.memory_space<vmem>>, vector<8x128xf32>
    tpu.vector_store %arg6[%c0_13, %c0_14], %20 {strides = array<i32>} : memref<8x128xf32, #tpu.memory_space<vmem>>, vector<8x128xf32>,
    %c0_15 = arith.constant 0 : index
    %c0_16 = arith.constant 0 : index
    %22 = vector.load %arg5[%c0_15, %c0_16] : memref<128x128xf32, #tpu.memory_space<vmem>>, vector<128x128xf32>
    %cst_17 = arith.constant dense<0.000000e+00> : vector<8x128xf32>
    %23 = tpu.matmul %20, %22, %cst_17 {dimension_numbers = #tpu.dot_dimension_numbers<[1], [0], [0], [1], [0, 0, 1, 1], [], []>} : vector<8x128xf32>, vector<128x128xf32>, vector<8x128xf32> -> vector<8x128xf32>
    %cst_18 = arith.constant 0.000000e+00 : f32
    %24 = vector.broadcast %cst_18 : f32 to vector<8x128xf32>
    %25 = arith.maximumf %23, %24 : vector<8x128xf32>
    %c0_19 = arith.constant 0 : index
    %c0_20 = arith.constant 0 : index
    %26 = vector.load %arg4[%c0_19, %c0_20] : memref<128x128xf32, #tpu.memory_space<vmem>>, vector<128x128xf32>
    %cst_21 = arith.constant dense<0.000000e+00> : vector<8x128xf32>
    %27 = tpu.matmul %25, %26, %cst_21 {dimension_numbers = #tpu.dot_dimension_numbers<[1], [0], [0], [1], [0, 0, 1, 1], [], []>} : vector<8x128xf32>, vector<128x128xf32>, vector<8x128xf32> -> vector<8x128xf32>
    %cst_22 = arith.constant 0.000000e+00 : f32
    %28 = vector.broadcast %cst_22 : f32 to vector<8x128xf32>
    %29 = arith.maximumf %27, %28 : vector<8x128xf32>
    %c0_23 = arith.constant 0 : index
    %c0_24 = arith.constant 0 : index
    %30 = vector.load %arg3[%c0_23, %c0_24] : memref<128x128xf32, #tpu.memory_space<vmem>>, vector<128x128xf32>
    %cst_25 = arith.constant dense<0.000000e+00> : vector<8x128xf32>
    %31 = tpu.matmul %29, %30, %cst_25 {dimension_numbers = #tpu.dot_dimension_numbers<[1], [0], [0], [1], [0, 0, 1, 1], [], []>} : vector<8x128xf32>, vector<128x128xf32>, vector<8x128xf32> -> vector<8x128xf32>
    %c0_26 = arith.constant 0 : index
    %c0_27 = arith.constant 0 : index
    %32 = vector.load %arg7[%c0_26, %c0_27] : memref<8x128xf32, #tpu.memory_space<vmem>>, vector<8x128xf32>
    tpu.vector_store %arg7[%c0_26, %c0_27], %31 {strides = array<i32>} : memref<8x128xf32, #tpu.memory_space<vmem>>, vector<8x128xf32>,
    return
  }
  func.func @transform_0(%arg0: i32) -> (i32, i32) {
    %c0_i32 = arith.constant 0 : i32
    %c0_i32_0 = arith.constant 0 : i32
    return %arg0, %c0_i32 : i32, i32
  }
  func.func @transform_1(%arg0: i32) -> (i32, i32) {
    %c0_i32 = arith.constant 0 : i32
    %c0_i32_0 = arith.constant 0 : i32
    %c0_i32_1 = arith.constant 0 : i32
    return %c0_i32, %c0_i32_0 : i32, i32
  }
  func.func @transform_2(%arg0: i32) -> (i32, i32) {
    %c0_i32 = arith.constant 0 : i32
    %c0_i32_0 = arith.constant 0 : i32
    %c0_i32_1 = arith.constant 0 : i32
    return %c0_i32, %c0_i32_0 : i32, i32
  }
  func.func @transform_3(%arg0: i32) -> (i32, i32) {
    %c0_i32 = arith.constant 0 : i32
    %c0_i32_0 = arith.constant 0 : i32
    %c0_i32_1 = arith.constant 0 : i32
    return %c0_i32, %c0_i32_0 : i32, i32
  }
  func.func @transform_4(%arg0: i32) -> (i32, i32) {
    %c0_i32 = arith.constant 0 : i32
    %c0_i32_0 = arith.constant 0 : i32
    %c0_i32_1 = arith.constant 0 : i32
    return %c0_i32, %c0_i32_0 : i32, i32
  }
  func.func @transform_5(%arg0: i32) -> (i32, i32) {
    %c0_i32 = arith.constant 0 : i32
    %c0_i32_0 = arith.constant 0 : i32
    return %arg0, %c0_i32 : i32, i32
  }
  func.func @transform_6(%arg0: i32) -> (i32, i32) {
    %c0_i32 = arith.constant 0 : i32
    %c0_i32_0 = arith.constant 0 : i32
    return %arg0, %c0_i32 : i32, i32
  }
}

</mosaic_0001>

<bundles_post_ra>
// kernel: tpu_custom_call.1
= control target key start
LH: loop header
LB: loop body
LE: loop exit
PB: predicated region body
PF: predicated region fallthrough
CT: control target
= control target key end

     0   :  { %12 = vsyncpa [#allocation3], 0  ;;  %s1551_s0 = inlined_call_operand.hbm [shape: f32[8,128], index: 0, kind: input, shape index: {}]   ;;  %s1552_s1 = inlined_call_operand.hbm [shape: f32[3,128], index: 1, kind: input, shape index: {}]   ;;  %s1553_s2 = inlined_call_operand.hbm [shape: f32[128,128], index: 2, kind: input, shape index: {}]   ;;  %s1554_s3 = inlined_call_operand.hbm [shape: f32[128,128], index: 3, kind: input, shape index: {}]   ;;  %s1555_s4 = inlined_call_operand.hbm [shape: f32[128,128], index: 4, kind: input, shape index: {}]   ;;  %s1556_s5 = inlined_call_operand.hbm [shape: f32[8,128], index: 5, kind: output, shape index: {0}]   ;;  %s1557_s6 = inlined_call_operand.hbm [shape: f32[8,128], index: 6, kind: output, shape index: {1}]  }
   0x1   :  { %13 = vsyncpa [#allocation6], 0 }
   0x2   :  { %14 = vsyncpa [#allocation9], 0 }
   0x3   :  { %15 = vsyncpa [#allocation4], 0 }
   0x4   :  { %16 = vsyncpa [#allocation13], 0  ;;  %s1287_s21 = smov [#allocation5]   ;;  %s1123_s25 = scalar_lea.hbm %s1552_s1, 64 }
   0x5   :  { %s33_s22 = sshll.u32 %s1287_s21, 4  ;;  %p1124_p0 = scmp.ne.s32.totalorder %s1552_s1, %s1123_s25  ;;  %s34_s22 = int_to_ptr.vmem [resolvable:$true] %s33_s22 }
   0x6   :  { %p1127_p1 = scmp.lt.u32.totalorder %s1123_s25, %s1552_s1 }
   0x8   :  { %p1129_p2 = pnand %p1127_p1, %p1124_p0 }
   0xa   :  { %1132 = shalt.err (!%p1129_p2)
}
   0xb   :  { %s1133_s30 = scalar_lea.vmem %s34_s22, 64  ;;  %p1138_p4 = scmp.lt.s32.totalorder %s34_s22, %s34_s22 }
   0xc   :  { %p1134_p3 = scmp.ne.s32.totalorder %s34_s22, %s1133_s30  ;;  %p1139_p5 = scmp.lt.s32.totalorder %s1133_s30, %s1133_s30 }
   0xe   :  { %p1140_p6 = por %p1139_p5, %p1138_p4 }
  0x10   :  { %p1141_p7 = pnand %p1140_p6, %p1134_p3 }
  0x12   :  { %1144 = shalt.err (!%p1141_p7)
}
  0x13   :  { %36 = dma.hbm_to_vmem [thread:$0]  %s1552_s1, 64, %s34_s22, [#allocation6]  }
  0x14   :  { %s1288_s9 = smov [#allocation8]   ;;  %s1289_s11 = smov [#allocation2]  }
  0x15   :  { %s54_s10 = sshll.u32 %s1288_s9, 4  ;;  %s23_s12 = sshll.u32 %s1289_s11, 4  ;;  %s55_s10 = int_to_ptr.vmem [resolvable:$true] %s54_s10  ;;  %s24_s12 = int_to_ptr.vmem [resolvable:$true] %s23_s12 }
  0x16   :  { %s1145_s15 = scalar_lea.hbm %s1554_s3, 2048 }
  0x17   :  { %p1146_p8 = scmp.ne.s32.totalorder %s1554_s3, %s1145_s15  ;;  %p1149_p9 = scmp.lt.u32.totalorder %s1145_s15, %s1554_s3 }
  0x19   :  { %p1151_p10 = pnand %p1149_p9, %p1146_p8 }
  0x1b   :  { %1154 = shalt.err (!%p1151_p10)
}
  0x1c   :  { %s1155_s1 = scalar_lea.vmem %s55_s10, 2048  ;;  %p1160_p12 = scmp.lt.s32.totalorder %s55_s10, %s55_s10 }
  0x1d   :  { %p1156_p11 = scmp.ne.s32.totalorder %s55_s10, %s1155_s1  ;;  %p1161_p13 = scmp.lt.s32.totalorder %s1155_s1, %s1155_s1 }
  0x1f   :  { %p1162_p0 = por %p1161_p13, %p1160_p12 }
  0x21   :  { %p1163_p1 = pnand %p1162_p0, %p1156_p11 }
  0x23   :  { %1166 = shalt.err (!%p1163_p1)
}
  0x24   :  { %s1290_s20 = smov 128   ;;  %s1291_s21 = smov 8  }
  0x25   :  { %60 = dma.hbm_to_vmem [thread:$0]  %s1554_s3, 2048, %s55_s10, [#allocation9], %s1290_s20, %s1290_s20, %s1291_s21  }
  0x26   :  { %s1167_s26 = scalar_lea.hbm %s1551_s0, 128 }
  0x27   :  { %p1168_p2 = scmp.ne.s32.totalorder %s1551_s0, %s1167_s26  ;;  %p1171_p3 = scmp.lt.u32.totalorder %s1167_s26, %s1551_s0 }
  0x29   :  { %p1173_p4 = pnand %p1171_p3, %p1168_p2 }
  0x2b   :  { %1176 = shalt.err (!%p1173_p4)
}
  0x2c   :  { %s1177_s7 = scalar_lea.vmem %s24_s12, 128  ;;  %p1182_p6 = scmp.lt.s32.totalorder %s24_s12, %s24_s12 }
  0x2d   :  { %p1178_p5 = scmp.ne.s32.totalorder %s24_s12, %s1177_s7  ;;  %p1183_p7 = scmp.lt.s32.totalorder %s1177_s7, %s1177_s7 }
  0x2f   :  { %p1184_p8 = por %p1183_p7, %p1182_p6 }
  0x31   :  { %p1185_p9 = pnand %p1184_p8, %p1178_p5 }
  0x33   :  { %1188 = shalt.err (!%p1185_p9)
}
  0x34   :  { %26 = dma.hbm_to_vmem [thread:$0]  %s1551_s0, 128, %s24_s12, [#allocation3]  }
  0x35   :  { %s1292_s9 = smov [#allocation7]   ;;  %s1293_s11 = smov [#allocation10]  }
  0x36   :  { %s42_s10 = sshll.u32 %s1292_s9, 4  ;;  %s66_s13 = sshll.u32 %s1293_s11, 4  ;;  %s43_s10 = int_to_ptr.vmem [resolvable:$true] %s42_s10  ;;  %s67_s13 = int_to_ptr.vmem [resolvable:$true] %s66_s13 }
  0x37   :  { %s1189_s16 = scalar_lea.hbm %s1553_s2, 2048 }
  0x38   :  { %p1190_p10 = scmp.ne.s32.totalorder %s1553_s2, %s1189_s16  ;;  %p1193_p11 = scmp.lt.u32.totalorder %s1189_s16, %s1553_s2 }
  0x3a   :  { %p1195_p12 = pnand %p1193_p11, %p1190_p10 }
  0x3c   :  { %1198 = shalt.err (!%p1195_p12)
}
  0x3d   :  { %s1199_s0 = scalar_lea.vmem %s43_s10, 2048  ;;  %p1204_p0 = scmp.lt.s32.totalorder %s43_s10, %s43_s10 }
  0x3e   :  { %p1200_p13 = scmp.ne.s32.totalorder %s43_s10, %s1199_s0  ;;  %p1205_p1 = scmp.lt.s32.totalorder %s1199_s0, %s1199_s0 }
  0x40   :  { %p1206_p2 = por %p1205_p1, %p1204_p0 }
  0x42   :  { %p1207_p3 = pnand %p1206_p2, %p1200_p13 }
  0x44   :  { %1210 = shalt.err (!%p1207_p3)
}
  0x45   :  { %48 = dma.hbm_to_vmem [thread:$0]  %s1553_s2, 2048, %s43_s10, [#allocation6], %s1290_s20, %s1290_s20, %s1291_s21  }
  0x46   :  { %s1211_s25 = scalar_lea.hbm %s1555_s4, 2048 }
  0x47   :  { %p1212_p4 = scmp.ne.s32.totalorder %s1555_s4, %s1211_s25  ;;  %p1215_p5 = scmp.lt.u32.totalorder %s1211_s25, %s1555_s4 }
  0x49   :  { %p1217_p6 = pnand %p1215_p5, %p1212_p4 }
  0x4b   :  { %1220 = shalt.err (!%p1217_p6)
}
  0x4c   :  { %s1221_s30 = scalar_lea.vmem %s67_s13, 2048  ;;  %p1226_p8 = scmp.lt.s32.totalorder %s67_s13, %s67_s13 }
  0x4d   :  { %p1222_p7 = scmp.ne.s32.totalorder %s67_s13, %s1221_s30  ;;  %p1227_p9 = scmp.lt.s32.totalorder %s1221_s30, %s1221_s30 }
  0x4f   :  { %p1228_p10 = por %p1227_p9, %p1226_p8 }
  0x51   :  { %p1229_p11 = pnand %p1228_p10, %p1222_p7 }
  0x53   :  { %1232 = shalt.err (!%p1229_p11)
}
  0x54   :  { %72 = dma.hbm_to_vmem [thread:$0]  %s1555_s4, 2048, %s67_s13, [#allocation9], %s1290_s20, %s1290_s20, %s1291_s21  }
  0x55   :  { %1277 = dma.done.wait [#allocation3], 128  }
  0x56   :  { %1278 = vsyncadd [#allocation3], 4294967168 }
  0x57   :  { %1279 = dma.done.wait [#allocation6], 2112  }
  0x58   :  { %1280 = vsyncadd [#allocation6], 4294965184 }
  0x59   :  { %1281 = dma.done.wait [#allocation9], 4096  }
  0x5a   :  { %1282 = vsyncadd [#allocation9], 4294963200  ;;  %v1294_v0 = vmov 0.0|0.0   ;;  %vm1295_vm0 = vmmov 0   ;;  %v1296_v1 = vmov 0.0   ;;  %v90_v2 = vld [vmem:[#allocation7] sm:$0xff] }
  0x5b   :  { %967 = vmatprep.subr.bf16.mxu0 %v1294_v0  ;;  %789 = vmatprep.mubr.msk.f32.mxu0 %vm1295_vm0, %v1296_v1  ;;  %v91_v3 = vld [vmem:[#allocation7 + $0x8] sm:$0xff]  ;;  %v92_v5 = vld [vmem:[#allocation7 + $0x10] sm:$0xff]  ;;  %v93_v6 = vld [vmem:[#allocation7 + $0x18] sm:$0xff]  ;;  %s1297_s4 = smov [#allocation11]  }
  0x5c   :  { %991 = vmatprep.subr.bf16.mxu1 %v1294_v0  ;;  %824 = vmatprep.mubr.msk.f32.mxu1 %vm1295_vm0, %v1296_v1  ;;  %v1409_v4 = vpack.c.bf16 %v91_v3, %v90_v2  ;;  %v181_v7 = vld [vmem:[#allocation8] sm:$0xff]  ;;  %v182_v8 = vld [vmem:[#allocation8 + $0x8] sm:$0xff]  ;;  %v1413_v9 = vpack.c.bf16 %v93_v6, %v92_v5  ;;  %v183_v11 = vld [vmem:[#allocation8 + $0x10] sm:$0xff]  ;;  %s630_s20 = sshll.u32 %s1297_s4, 4  ;;  %s631_s20 = int_to_ptr.vmem [resolvable:$true] %s630_s20 }
  0x5d   :  { %v1415_v10 = vpack.c.bf16 %v182_v8, %v181_v7  ;;  %v184_v12 = vld [vmem:[#allocation8 + $0x18] sm:$0xff]  ;;  %v94_v13 = vld [vmem:[#allocation7 + $0x20] sm:$0xff]  ;;  %v95_v14 = vld [vmem:[#allocation7 + $0x28] sm:$0xff]  ;;  %s1233_s21 = scalar_lea.vmem %s631_s20, 128  ;;  %p1238_p13 = scmp.lt.s32.totalorder %s631_s20, %s631_s20 }
  0x5e   :  { %969 = vmatpush3.bf16.xpose.msra.mxu0 %v1409_v4  ;;  %v1421_v15 = vpack.c.bf16 %v184_v12, %v183_v11  ;;  %v1423_v16 = vpack.c.bf16 %v95_v14, %v94_v13  ;;  %v185_v17 = vld [vmem:[#allocation8 + $0x20] sm:$0xff]  ;;  %v186_v18 = vld [vmem:[#allocation8 + $0x28] sm:$0xff]  ;;  %v96_v19 = vld [vmem:[#allocation7 + $0x30] sm:$0xff]  ;;  %p1234_p12 = scmp.ne.s32.totalorder %s631_s20, %s1233_s21  ;;  %p1239_p0 = scmp.lt.s32.totalorder %s1233_s21, %s1233_s21 }
  0x5f   :  { %970 = vmatprep.subr.bf16.mxu0 %v1294_v0  ;;  %993 = vmatpush3.bf16.xpose.msra.mxu1 %v1415_v10  ;;  %v97_v20 = vld [vmem:[#allocation7 + $0x38] sm:$0xff]  ;;  %v1429_v21 = vpack.c.bf16 %v186_v18, %v185_v17  ;;  %v187_v23 = vld [vmem:[#allocation8 + $0x30] sm:$0xff]  ;;  %v98_v25 = vld [vmem:[#allocation7 + $0x40] sm:$0xff]  ;;  %v106_v18 = vlaneseq }
  0x60   :  { %994 = vmatprep.subr.bf16.mxu1 %v1294_v0  ;;  %v1431_v22 = vpack.c.bf16 %v97_v20, %v96_v19  ;;  %v188_v24 = vld [vmem:[#allocation8 + $0x38] sm:$0xff]  ;;  %v99_v26 = vld [vmem:[#allocation7 + $0x48] sm:$0xff]  ;;  %v189_v29 = vld [vmem:[#allocation8 + $0x40] sm:$0xff]  ;;  %p1240_p1 = por %p1239_p0, %p1238_p13 }
  0x61   :  { %v1437_v27 = vpack.c.bf16 %v188_v24, %v187_v23  ;;  %v1439_v28 = vpack.c.bf16 %v99_v26, %v98_v25  ;;  %v190_v30 = vld [vmem:[#allocation8 + $0x48] sm:$0xff]  ;;  %v100_v31 = vld [vmem:[#allocation7 + $0x50] sm:$0xff]  ;;  %v101_v32 = vld [vmem:[#allocation7 + $0x58] sm:$0xff]  ;;  %v107_v19 = vshrl.u32 %v106_v18, 7 }
  0x62   :  { %v1445_v33 = vpack.c.bf16 %v190_v30, %v189_v29  ;;  %v1447_v34 = vpack.c.bf16 %v101_v32, %v100_v31  ;;  %v191_v35 = vld [vmem:[#allocation8 + $0x50] sm:$0xff]  ;;  %v192_v36 = vld [vmem:[#allocation8 + $0x58] sm:$0xff]  ;;  %v102_v37 = vld [vmem:[#allocation7 + $0x60] sm:$0xff]  ;;  %p1241_p2 = pnand %p1240_p1, %p1234_p12 }
  0x63   :  { %v103_v38 = vld [vmem:[#allocation7 + $0x68] sm:$0xff]  ;;  %v1453_v39 = vpack.c.bf16 %v192_v36, %v191_v35  ;;  %v193_v41 = vld [vmem:[#allocation8 + $0x60] sm:$0xff]  ;;  %v104_v43 = vld [vmem:[#allocation7 + $0x70] sm:$0xff]  ;;  %v108_v20 = vsub.s32 0, %v107_v19  ;;  %v199_v31 = vsub.s32 1, %v107_v19 }
  0x64   :  { %v1455_v40 = vpack.c.bf16 %v103_v38, %v102_v37  ;;  %v194_v42 = vld [vmem:[#allocation8 + $0x68] sm:$0xff]  ;;  %v105_v44 = vld [vmem:[#allocation7 + $0x78] sm:$0xff]  ;;  %v195_v47 = vld [vmem:[#allocation8 + $0x70] sm:$0xff] }
  0x65   :  { %v1461_v45 = vpack.c.bf16 %v194_v42, %v193_v41  ;;  %v1463_v46 = vpack.c.bf16 %v105_v44, %v104_v43  ;;  %v196_v48 = vld [vmem:[#allocation8 + $0x78] sm:$0xff]  ;;  %v272_v51 = vld [vmem:[#allocation10] sm:$0xff]  ;;  %v273_v52 = vld [vmem:[#allocation10 + $0x8] sm:$0xff] }
  0x66   :  { %972 = vmatpush3.bf16.xpose.msra.mxu0 %v1413_v9  ;;  %v1469_v49 = vpack.c.bf16 %v196_v48, %v195_v47  ;;  %v89_v50 = vld [vmem:[#allocation2] sm:$0xff]  ;;  %v1016_v53 = vpack.c.bf16 %v273_v52, %v272_v51  ;;  %v276_v57 = vld [vmem:[#allocation10 + $0x20] sm:$0xff]  ;;  %v277_v58 = vld [vmem:[#allocation10 + $0x28] sm:$0xff] }
  0x67   :  { %973 = vmatprep.subr.bf16.mxu0 %v1294_v0  ;;  %996 = vmatpush3.bf16.xpose.msra.mxu1 %v1421_v15  ;;  %v274_v54 = vld [vmem:[#allocation10 + $0x10] sm:$0xff]  ;;  %v275_v55 = vld [vmem:[#allocation10 + $0x18] sm:$0xff]  ;;  %v1022_v59 = vpack.c.bf16 %v277_v58, %v276_v57  ;;  %v280_v63 = vld [vmem:[#allocation10 + $0x40] sm:$0xff] }
  0x68   :  { %997 = vmatprep.subr.bf16.mxu1 %v1294_v0  ;;  %v1019_v56 = vpack.c.bf16 %v275_v55, %v274_v54  ;;  %v278_v60 = vld [vmem:[#allocation10 + $0x30] sm:$0xff]  ;;  %v279_v61 = vld [vmem:[#allocation10 + $0x38] sm:$0xff]  ;;  %v281_v2 = vld [vmem:[#allocation10 + $0x48] sm:$0xff] }
  0x69   :  { %v1025_v62 = vpack.c.bf16 %v279_v61, %v278_v60  ;;  %v1028_v3 = vpack.c.bf16 %v281_v2, %v280_v63  ;;  %v282_v5 = vld [vmem:[#allocation10 + $0x50] sm:$0xff]  ;;  %v283_v6 = vld [vmem:[#allocation10 + $0x58] sm:$0xff]  ;;  %v284_v8 = vld [vmem:[#allocation10 + $0x60] sm:$0xff] }
  0x6a   :  { %v1031_v7 = vpack.c.bf16 %v283_v6, %v282_v5  ;;  %v285_v11 = vld [vmem:[#allocation10 + $0x68] sm:$0xff]  ;;  %v286_v13 = vld [vmem:[#allocation10 + $0x70] sm:$0xff]  ;;  %v287_v14 = vld [vmem:[#allocation10 + $0x78] sm:$0xff] }
  0x6b   :  { %v1034_v12 = vpack.c.bf16 %v285_v11, %v284_v8  ;;  %v1037_v17 = vpack.c.bf16 %v287_v14, %v286_v13  ;;  %v88_v23 = vld [vmem:[#allocation5] sm:$0x7] }
  0x6c   :  { %v109_v24 = vrot.slane %v88_v23, %v108_v20  ;;  %v200_v32 = vrot.slane %v88_v23, %v199_v31 }
  0x6e   :  { %975 = vmatpush3.bf16.xpose.msra.mxu0 %v1423_v16 }
  0x6f   :  { %976 = vmatprep.subr.bf16.mxu0 %v1294_v0  ;;  %999 = vmatpush3.bf16.xpose.msra.mxu1 %v1429_v21 }
  0x70   :  { %1000 = vmatprep.subr.bf16.mxu1 %v1294_v0 }
  0x76   :  { %978 = vmatpush3.bf16.xpose.msra.mxu0 %v1431_v22 }
  0x77   :  { %979 = vmatprep.subr.bf16.mxu0 %v1294_v0  ;;  %1002 = vmatpush3.bf16.xpose.msra.mxu1 %v1437_v27 }
  0x78   :  { %1003 = vmatprep.subr.bf16.mxu1 %v1294_v0 }
  0x7e   :  { %981 = vmatpush3.bf16.xpose.msra.mxu0 %v1439_v28 }
  0x7f   :  { %982 = vmatprep.subr.bf16.mxu0 %v1294_v0  ;;  %1005 = vmatpush3.bf16.xpose.msra.mxu1 %v1445_v33 }
  0x80   :  { %1006 = vmatprep.subr.bf16.mxu1 %v1294_v0 }
  0x86   :  { %984 = vmatpush3.bf16.xpose.msra.mxu0 %v1447_v34 }
  0x87   :  { %985 = vmatprep.subr.bf16.mxu0 %v1294_v0  ;;  %1008 = vmatpush3.bf16.xpose.msra.mxu1 %v1453_v39 }
  0x88   :  { %1009 = vmatprep.subr.bf16.mxu1 %v1294_v0 }
  0x8e   :  { %987 = vmatpush3.bf16.xpose.msra.mxu0 %v1455_v40 }
  0x8f   :  { %988 = vmatprep.subr.bf16.mxu0 %v1294_v0  ;;  %1011 = vmatpush3.bf16.xpose.msra.mxu1 %v1461_v45 }
  0x90   :  { %1012 = vmatprep.subr.bf16.mxu1 %v1294_v0 }
  0x96   :  { %990 = vmatpush3.bf16.xpose.msra.mxu0 %v1463_v46 }
  0x97   :  { %1015 = vmatprep.subr.bf16.mxu0 %v1294_v0  ;;  %1014 = vmatpush3.bf16.xpose.msra.mxu1 %v1469_v49 }
  0x98   :  { %1039 = vmatprep.subr.bf16.mxu1 %v1294_v0 }
  0x9d   :  { %790 = vmatmul.mubr.f32.vlgmr.msra.gmra.mrb[0].mxu0 %v89_v50 }
  0x9e   :  { %859 = vmatprep.mubr.msk.f32.mxu0 %vm1295_vm0, %v1296_v1  ;;  %1017 = vmatpush3.bf16.xpose.msra.mxu0 %v1016_v53 }
  0x9f   :  { %1018 = vmatprep.subr.bf16.mxu0 %v1294_v0 }
  0xa6   :  { %1020 = vmatpush3.bf16.xpose.msra.mxu0 %v1019_v56 }
  0xa7   :  { %1021 = vmatprep.subr.bf16.mxu0 %v1294_v0 }
  0xae   :  { %1023 = vmatpush3.bf16.xpose.msra.mxu0 %v1022_v59 }
  0xaf   :  { %1024 = vmatprep.subr.bf16.mxu0 %v1294_v0 }
  0xb6   :  { %1026 = vmatpush3.bf16.xpose.msra.mxu0 %v1025_v62 }
  0xb7   :  { %1027 = vmatprep.subr.bf16.mxu0 %v1294_v0 }
  0xbe   :  { %1029 = vmatpush3.bf16.xpose.msra.mxu0 %v1028_v3 }
  0xbf   :  { %1030 = vmatprep.subr.bf16.mxu0 %v1294_v0 }
  0xc6   :  { %1032 = vmatpush3.bf16.xpose.msra.mxu0 %v1031_v7 }
  0xc7   :  { %1033 = vmatprep.subr.bf16.mxu0 %v1294_v0 }
  0xce   :  { %1035 = vmatpush3.bf16.xpose.msra.mxu0 %v1034_v12 }
  0xcf   :  { %1036 = vmatprep.subr.bf16.mxu0 %v1294_v0 }
  0xd6   :  { %1038 = vmatpush3.bf16.xpose.msra.mxu0 %v1037_v17 }
  0xd7   :  { %1087 = vmatprep.subr.bf16.mxu0 %v1294_v0 }
 0x170   :  { %v176_v25 = vpop.f32.mrb[0].mxu0 }
 0x171   :  { %v177_v26 = vadd.f32 %v176_v25, %v109_v24  ;;  %v791_v29 = vpop.f32.mrb[1].mxu0 }
 0x173   :  { %v180_v30 = vmax.f32 %v177_v26, 0.0 }
 0x175   :  { %825 = vmatmul.mubr.f32.vlgmr.msra.gmra.mrb[0].mxu1 %v180_v30 }
 0x176   :  { %1041 = vmatpush3.bf16.msra.mxu1 %v1016_v53  ;;  %894 = vmatprep.mubr.msk.f32.mxu1 %vm1295_vm0, %v1296_v1 }
 0x177   :  { %1042 = vmatprep.subr.bf16.mxu1 %v1294_v0 }
 0x17a   :  { %1044 = vmatpush3.bf16.msra.mxu1 %v1019_v56 }
 0x17b   :  { %1045 = vmatprep.subr.bf16.mxu1 %v1294_v0 }
 0x17e   :  { %1047 = vmatpush3.bf16.msra.mxu1 %v1022_v59 }
 0x17f   :  { %1048 = vmatprep.subr.bf16.mxu1 %v1294_v0 }
 0x182   :  { %1050 = vmatpush3.bf16.msra.mxu1 %v1025_v62 }
 0x183   :  { %1051 = vmatprep.subr.bf16.mxu1 %v1294_v0 }
 0x186   :  { %1053 = vmatpush3.bf16.msra.mxu1 %v1028_v3 }
 0x187   :  { %1054 = vmatprep.subr.bf16.mxu1 %v1294_v0 }
 0x18a   :  { %1056 = vmatpush3.bf16.msra.mxu1 %v1031_v7 }
 0x18b   :  { %1057 = vmatprep.subr.bf16.mxu1 %v1294_v0 }
 0x18e   :  { %1059 = vmatpush3.bf16.msra.mxu1 %v1034_v12 }
 0x18f   :  { %1060 = vmatprep.subr.bf16.mxu1 %v1294_v0 }
 0x192   :  { %1062 = vmatpush3.bf16.msra.mxu1 %v1037_v17 }
 0x193   :  { %1063 = vmatprep.subr.bf16.mxu1 %v1294_v0 }
 0x248   :  { %v267_v35 = vpop.f32.mrb[0].mxu1 }
 0x249   :  { %v268_v36 = vadd.f32 %v267_v35, %v200_v32  ;;  %v826_v37 = vpop.f32.mrb[1].mxu1 }
 0x24b   :  { %v271_v38 = vmax.f32 %v268_v36, 0.0 }
 0x24d   :  { %860 = vmatmul.mubr.f32.vlgmr.msra.gmra.mrb[2].mxu0 %v271_v38 }
 0x24e   :  { %1089 = vmatpush3.bf16.msra.mxu0 %v1409_v4  ;;  %964 = vmatprep.mubr.msk.f32.mxu0 %vm1295_vm0, %v1296_v1  ;;  %v290_v4 = vsub.s32 2, %v107_v19 }
 0x24f   :  { %1090 = vmatprep.subr.bf16.mxu0 %v1294_v0 }
 0x252   :  { %1092 = vmatpush3.bf16.msra.mxu0 %v1413_v9  ;;  %v291_v9 = vrot.slane %v88_v23, %v290_v4 }
 0x253   :  { %1093 = vmatprep.subr.bf16.mxu0 %v1294_v0 }
 0x256   :  { %1095 = vmatpush3.bf16.msra.mxu0 %v1423_v16 }
 0x257   :  { %1096 = vmatprep.subr.bf16.mxu0 %v1294_v0 }
 0x25a   :  { %1098 = vmatpush3.bf16.msra.mxu0 %v1431_v22 }
 0x25b   :  { %1099 = vmatprep.subr.bf16.mxu0 %v1294_v0 }
 0x25e   :  { %1101 = vmatpush3.bf16.msra.mxu0 %v1439_v28 }
 0x25f   :  { %1102 = vmatprep.subr.bf16.mxu0 %v1294_v0 }
 0x262   :  { %1104 = vmatpush3.bf16.msra.mxu0 %v1447_v34 }
 0x263   :  { %1105 = vmatprep.subr.bf16.mxu0 %v1294_v0 }
 0x266   :  { %1107 = vmatpush3.bf16.msra.mxu0 %v1455_v40 }
 0x267   :  { %1108 = vmatprep.subr.bf16.mxu0 %v1294_v0 }
 0x26a   :  { %1110 = vmatpush3.bf16.msra.mxu0 %v1463_v46 }
 0x320   :  { %v358_v16 = vpop.f32.mrb[2].mxu0 }
 0x321   :  { %v359_v22 = vadd.f32 %v358_v16, %v291_v9  ;;  %v861_v41 = vpop.f32.mrb[3].mxu0 }
 0x323   :  { %362 = vst [vmem:[#allocation11] sm:$0xff] %v359_v22  ;;  %895 = vmatmul.mubr.f32.vlgmr.msra.gmra.mrb[2].mxu1 %v359_v22 }
 0x324   :  { %1065 = vmatpush3.bf16.msra.mxu1 %v1415_v10  ;;  %929 = vmatprep.mubr.msk.f32.mxu1 %vm1295_vm0, %v1296_v1 }
 0x325   :  { %1066 = vmatprep.subr.bf16.mxu1 %v1294_v0 }
 0x328   :  { %1068 = vmatpush3.bf16.msra.mxu1 %v1421_v15 }
 0x329   :  { %1069 = vmatprep.subr.bf16.mxu1 %v1294_v0 }
 0x32c   :  { %1071 = vmatpush3.bf16.msra.mxu1 %v1429_v21 }
 0x32d   :  { %1072 = vmatprep.subr.bf16.mxu1 %v1294_v0 }
 0x330   :  { %1074 = vmatpush3.bf16.msra.mxu1 %v1437_v27 }
 0x331   :  { %1075 = vmatprep.subr.bf16.mxu1 %v1294_v0 }
 0x334   :  { %1077 = vmatpush3.bf16.msra.mxu1 %v1445_v33 }
 0x335   :  { %1078 = vmatprep.subr.bf16.mxu1 %v1294_v0 }
 0x338   :  { %1080 = vmatpush3.bf16.msra.mxu1 %v1453_v39 }
 0x339   :  { %1081 = vmatprep.subr.bf16.mxu1 %v1294_v0 }
 0x33c   :  { %1083 = vmatpush3.bf16.msra.mxu1 %v1461_v45 }
 0x33d   :  { %1084 = vmatprep.subr.bf16.mxu1 %v1294_v0 }
 0x340   :  { %1086 = vmatpush3.bf16.msra.mxu1 %v1469_v49 }
 0x3f6   :  { %v445_v1 = vpop.f32.mrb[2].mxu1 }
 0x3f7   :  { %v449_v10 = vmax.f32 %v445_v1, 0.0  ;;  %v896_v15 = vpop.f32.mrb[3].mxu1 }
 0x3f9   :  { %930 = vmatmul.mubr.f32.vlgmr.msra.gmra.mrb[4].mxu1 %v449_v10 }
 0x4cc   :  { %v532_v21 = vpop.f32.mrb[4].mxu1 }
 0x4cd   :  { %v536_v27 = vmax.f32 %v532_v21, 0.0  ;;  %v931_v28 = vpop.f32.mrb[5].mxu1 }
 0x4cf   :  { %965 = vmatmul.mubr.f32.vlgmr.msra.gmra.mrb[4].mxu0 %v536_v27 }
 0x4d0   :  { %1244 = shalt.err (!%p1241_p2)
}
 0x4d1   :  { %s1245_s9 = scalar_lea.hbm %s1556_s5, 128 }
 0x4d2   :  { %p1246_p3 = scmp.ne.s32.totalorder %s1556_s5, %s1245_s9  ;;  %p1249_p4 = scmp.lt.u32.totalorder %s1245_s9, %s1556_s5 }
 0x4d4   :  { %p1251_p5 = pnand %p1249_p4, %p1246_p3 }
 0x4d6   :  { %1254 = shalt.err (!%p1251_p5)
}
 0x4d7   :  { %633 = dma.vmem_to_hbm [thread:$0]  %s631_s20, 128, %s1556_s5, [#allocation4]  }
 0x4d8   :  { %s1298_s17 = smov [#allocation12]  }
 0x4d9   :  { %s640_s18 = sshll.u32 %s1298_s17, 4  ;;  %s641_s18 = int_to_ptr.vmem [resolvable:$true] %s640_s18 }
 0x4da   :  { %s1255_s19 = scalar_lea.vmem %s641_s18, 128  ;;  %p1260_p7 = scmp.lt.s32.totalorder %s641_s18, %s641_s18 }
 0x4db   :  { %p1256_p6 = scmp.ne.s32.totalorder %s641_s18, %s1255_s19  ;;  %p1261_p8 = scmp.lt.s32.totalorder %s1255_s19, %s1255_s19 }
 0x4dd   :  { %p1262_p9 = por %p1261_p8, %p1260_p7 }
 0x4df   :  { %p1263_p10 = pnand %p1262_p9, %p1256_p6 }
 0x5a2   :  { %v619_v0 = vpop.f32.mrb[4].mxu0 }
 0x5a3   :  { %623 = vst [vmem:[#allocation12] sm:$0xff] %v619_v0  ;;  %v966_v33 = vpop.f32.mrb[5].mxu0 }
 0x5a4   :  { %1266 = shalt.err (!%p1263_p10)
}
 0x5a5   :  { %s1267_s12 = scalar_lea.hbm %s1557_s6, 128 }
 0x5a6   :  { %p1268_p11 = scmp.ne.s32.totalorder %s1557_s6, %s1267_s12  ;;  %p1271_p12 = scmp.lt.u32.totalorder %s1267_s12, %s1557_s6 }
 0x5a8   :  { %p1273_p13 = pnand %p1271_p12, %p1268_p11 }
 0x5aa   :  { %1276 = shalt.err (!%p1273_p13)
}
 0x5ab   :  { %643 = dma.vmem_to_hbm [thread:$0]  %s641_s18, 128, %s1557_s6, [#allocation13]  }
 0x5ac   :  { %1283 = dma.done.wait [#allocation4], 128  }
 0x5ad   :  { %1284 = vsyncadd [#allocation4], 4294967168 }
 0x5ae   :  { %1285 = dma.done.wait [#allocation13], 128  }
 0x5af   :  { %1286 = vsyncadd [#allocation13], 4294967168 }
 0x5b0   :  { %650 = vsyncpa [#allocation3], 1 }
 0x5b1   :  { %651 = vsyncpa [#allocation6], 1 }
 0x5b2   :  { %652 = vsyncpa [#allocation9], 1 }
 0x5b3   :  { %653 = vsyncpa [#allocation4], 1 }
 0x5b4   :  { %654 = vsyncpa [#allocation13], 1 }

</bundles_post_ra>
